<compile_context>
chip_gen: v5e
topology: v5e:2x2
jax: 0.10.0
libtpu: 0.0.40
codegen_flags: <defaults>
</compile_context>

<pallas_src>
import functools

import jax
import jax.numpy as jnp
from jax import lax
from jax.experimental import pallas as pl
from jax.experimental.pallas import tpu as pltpu


_BIG = 1e30  # sentinel magnitude (only breaks for |x| >= 1e30 or non-finite x)


def _get_positive_k(k, n):
    if k <= 0:
        return 0
    elif k < 1:
        return round(k * n)
    elif k > n:
        return int(n)
    else:
        return int(k)


def _topk_weighted(xv, k, *, largest, beta, unroll_limit=8):
    """Weighted-sum accumulators over the exact top-k of each row.

    Returns (num, den, loss) with
      num  = sum_i w(v_i) * v_i,   den = sum_i w(v_i),
      loss = sum_i sigmoid(v_i)^2            (only used for largest=False)
    where w(v) = sigmoid(v)^beta (largest) or sigmoid(-v)^beta (smallest) and
    the v_i are the exact top-k values *including duplicates* (torch.topk
    semantics), handled via a tie count clamped by the remaining budget.
    """
    rows, _ = xv.shape
    sentinel = jnp.asarray(-_BIG if largest else _BIG, xv.dtype)
    zeros = jnp.zeros((rows, 1), jnp.float32)

    def body(_, carry):
        xa, num, den, rem, loss = carry
        if largest:
            m = jnp.max(xa, axis=1, keepdims=True)          # XLU reduce
        else:
            m = jnp.min(xa, axis=1, keepdims=True)          # XLU reduce
        is_sel = xa == m                                     # 1 VPU compare (reused)
        cnt = jnp.sum(is_sel.astype(jnp.float32), axis=1, keepdims=True)
        take = jnp.minimum(cnt, rem)                         # exact duplicate handling
        mf = m.astype(jnp.float32)
        s = jax.nn.sigmoid(mf)
        w = (s if largest else (1.0 - s)) ** beta            # sigmoid(-m) == 1 - sigmoid(m)
        num = num + (take * w) * mf
        den = den + take * w
        if not largest:
            loss = loss + take * (s * s)
        rem = rem - take
        xa = jnp.where(is_sel, sentinel, xa)                 # 1 VPU select
        return xa, num, den, rem, loss

    carry = (xv, zeros, zeros, jnp.full((rows, 1), float(k), jnp.float32), zeros)
    if k <= unroll_limit:
        for i in range(k):                                   # small static k: unroll
            carry = body(i, carry)
    else:
        carry = lax.fori_loop(0, k, body, carry)             # large / fractional k
    _, num, den, _, loss = carry
    return num, den, loss


def _maxmin_kernel(x_ref, out_ref, loss_ref, *, kmax, kmin, alpha, beta,
                   compute_dtype):
    # x_ref: (TR, N) rows = flattened (batch, channel); out_ref/loss_ref: (TR, 1)
    xv = x_ref[...]
    if xv.dtype != compute_dtype:
        xv = xv.astype(compute_dtype)
    rows = xv.shape[0]

    out = jnp.zeros((rows, 1), jnp.float32)
    loss = jnp.zeros((rows, 1), jnp.float32)

    if kmax > 0:                                             # static guard: no 0/0 NaN
        num_mx, den_mx, _ = _topk_weighted(xv, kmax, largest=True, beta=beta)
        out = num_mx / den_mx
    if kmin > 0:
        num_mn, den_mn, loss_acc = _topk_weighted(xv, kmin, largest=False,
                                                  beta=beta)
        out = out + alpha * (num_mn / den_mn)
        loss = loss_acc / kmin

    out_ref[...] = out.astype(out_ref.dtype)
    loss_ref[...] = loss


def _pick_block_rows(total_rows, n, in_itemsize, compute_itemsize,
                     vmem_budget_bytes=4 * 1024 * 1024):
    """Largest divisor of total_rows whose working set fits the VMEM budget."""
    # per row: double-buffered input block + ~4 live working copies in-kernel
    per_row = n * (2 * in_itemsize + 4 * compute_itemsize)
    cap = max(1, vmem_budget_bytes // per_row)
    if total_rows <= cap:
        return total_rows
    best = 1
    d = 1
    while d * d <= total_rows:
        if total_rows % d == 0:
            for cand in (d, total_rows // d):
                if cand <= cap and cand > best:
                    best = cand
        d += 1
    return best


def maxmin_pool1d(x, labels=None, *, kmax=1, kmin=None, alpha=1, beta=2,
                  random_drop=0.1, training=False):
    """Eval-mode forward of MaxMinPool1d. Returns (output, extra_loss)."""
    # TODO(synk): training-mode random_drop mask (uniform > p + multinomial
    # scatter) is stochastic; only eval-mode semantics are implemented.
    del random_drop, training
    if kmin is None:
        kmin = kmax
    B, C, N = x.shape
    kmax_e = _get_positive_k(kmax, N)
    kmin_e = _get_positive_k(kmin, N)

    # bf16 inputs keep the hot (rows, N) path in bf16 (v6e/v7x bf16 VPU);
    # everything else (incl. v5e users who should cast up-front) runs in f32.
    if x.dtype == jnp.bfloat16:
        compute_dtype = jnp.bfloat16
        compute_itemsize = 2
    else:
        compute_dtype = jnp.float32
        compute_itemsize = 4

    rows = B * C
    x2d = x.reshape(rows, N)       # fold channels into sublanes -> dense tiles
    tr = _pick_block_rows(rows, N, x.dtype.itemsize, compute_itemsize)
    num_blocks = rows // tr

    kernel = functools.partial(_maxmin_kernel, kmax=kmax_e, kmin=kmin_e,
                               alpha=alpha, beta=beta,
                               compute_dtype=compute_dtype)
    out_flat, loss_flat = pl.pallas_call(
        kernel,
        grid=(num_blocks,),
        in_specs=[pl.BlockSpec((tr, N), lambda r: (r, 0))],
        out_specs=[pl.BlockSpec((tr, 1), lambda r: (r, 0)),
                   pl.BlockSpec((tr, 1), lambda r: (r, 0))],
        out_shape=[jax.ShapeDtypeStruct((rows, 1), x.dtype),
                   jax.ShapeDtypeStruct((rows, 1), jnp.float32)],
        compiler_params=pltpu.CompilerParams(
            dimension_semantics=("parallel",)),
    )(x2d)

    out = out_flat.reshape(B, C)
    extra_loss = None
    if labels is not None and kmin_e != 0:
        extra_loss = jnp.sum(loss_flat)
    return out, extra_loss


def _reference(x, kmax_e, kmin_e, alpha, beta):
    """Pure-JAX reference mirroring the PyTorch eval-mode forward."""
    kmax_v = jax.lax.top_k(x, kmax_e)[0]
    kmin_v = -jax.lax.top_k(-x, kmin_e)[0]
    lm = jax.nn.sigmoid(kmax_v) ** beta
    wmax = lm / lm.sum(2, keepdims=True)
    ln = jax.nn.sigmoid(-kmin_v) ** beta
    wmin = ln / ln.sum(2, keepdims=True)
    out = (kmax_v * wmax).sum(2)
    if kmin_e != 0:
        out = out + alpha * (kmin_v * wmin).sum(2)
    loss = ((jax.nn.sigmoid(kmin_v) ** 2).sum(2) / kmin_e).sum()
    return out, loss


if __name__ == "__main__":
    key = jax.random.PRNGKey(0)
    B, C, N = 2, 4, 16
    x = jax.random.normal(key, (B, C, N), dtype=jnp.float32)
    labels = jnp.ones((B,), dtype=jnp.int32)   # only used as a "not None" flag

    kmax, kmin, alpha, beta = 2, 2, 1, 2
    out, extra_loss = maxmin_pool1d(x, labels, kmax=kmax, kmin=kmin,
                                    alpha=alpha, beta=beta)
    jax.block_until_ready(out)
    jax.block_until_ready(extra_loss)

    ref_out, ref_loss = _reference(x, kmax, kmin, alpha, beta)
    assert out.shape == (B, C)
    assert jnp.allclose(out, ref_out, atol=1e-5, rtol=1e-5)
    assert jnp.allclose(extra_loss, ref_loss, atol=1e-5, rtol=1e-5)

    print("KERNEL_OK")
</pallas_src>

<mosaic_0001>
module attributes {stable_mosaic.version = 11 : i64} {
  func.func @_maxmin_kernel(%arg0: i32, %arg1: memref<8x16xf32, #tpu.memory_space<vmem>>, %arg2: memref<8x1xf32, #tpu.memory_space<vmem>>, %arg3: memref<8x1xf32, #tpu.memory_space<vmem>>) attributes {dimension_semantics = [#tpu.dimension_semantics<parallel>], iteration_bounds = array<i64: 1>, scalar_prefetch = 0 : i64, scratch_operands = 0 : i64, tpu.core_type = #tpu.core_type<tc>, window_params = [{transform_indices = @transform_0, window_bounds = array<i64: 8, 16>}, {transform_indices = @transform_1, window_bounds = array<i64: 8, 1>}, {transform_indices = @transform_2, window_bounds = array<i64: 8, 1>}]} {
    %c0 = arith.constant 0 : index
    %c0_0 = arith.constant 0 : index
    %0 = vector.load %arg1[%c0, %c0_0] : memref<8x16xf32, #tpu.memory_space<vmem>>, vector<8x16xf32>
    %cst = arith.constant 0.000000e+00 : f32
    %1 = vector.broadcast %cst : f32 to vector<8x1xf32>
    %cst_1 = arith.constant 2.000000e+00 : f32
    %2 = vector.broadcast %cst_1 : f32 to vector<8x1xf32>
    %cst_2 = arith.constant dense<0xFF800000> : vector<8xf32>
    %3 = vector.multi_reduction <maximumf>, %0, %cst_2 [1] : vector<8x16xf32> to vector<8xf32>
    %4 = vector.shape_cast %3 : vector<8xf32> to vector<8x1xf32>
    %5 = vector.broadcast %4 : vector<8x1xf32> to vector<8x16xf32>
    %6 = arith.cmpf oeq, %0, %5 : vector<8x16xf32>
    %7 = arith.extui %6 : vector<8x16xi1> to vector<8x16xi32>
    %8 = arith.sitofp %7 : vector<8x16xi32> to vector<8x16xf32>
    %cst_3 = arith.constant dense<0.000000e+00> : vector<8xf32>
    %9 = vector.multi_reduction <add>, %8, %cst_3 [1] : vector<8x16xf32> to vector<8xf32>
    %10 = vector.shape_cast %9 : vector<8xf32> to vector<8x1xf32>
    %11 = arith.minimumf %10, %2 : vector<8x1xf32>
    %12 = arith.negf %4 : vector<8x1xf32>
    %13 = math.exp %12 : vector<8x1xf32>
    %cst_4 = arith.constant 1.000000e+00 : f32
    %14 = vector.broadcast %cst_4 : f32 to vector<8x1xf32>
    %15 = arith.addf %14, %13 : vector<8x1xf32>
    %16 = arith.divf %14, %15 : vector<8x1xf32>
    %17 = arith.mulf %16, %16 : vector<8x1xf32>
    %18 = arith.mulf %11, %17 : vector<8x1xf32>
    %19 = arith.mulf %18, %4 : vector<8x1xf32>
    %20 = arith.addf %1, %19 : vector<8x1xf32>
    %21 = arith.mulf %11, %17 : vector<8x1xf32>
    %22 = arith.addf %1, %21 : vector<8x1xf32>
    %23 = arith.subf %2, %11 : vector<8x1xf32>
    %cst_5 = arith.constant -1.000000e+30 : f32
    %24 = vector.broadcast %cst_5 : f32 to vector<8x16xf32>
    %25 = arith.select %6, %24, %0 : vector<8x16xi1>, vector<8x16xf32>
    %cst_6 = arith.constant dense<0xFF800000> : vector<8xf32>
    %26 = vector.multi_reduction <maximumf>, %25, %cst_6 [1] : vector<8x16xf32> to vector<8xf32>
    %27 = vector.shape_cast %26 : vector<8xf32> to vector<8x1xf32>
    %28 = vector.broadcast %27 : vector<8x1xf32> to vector<8x16xf32>
    %29 = arith.cmpf oeq, %25, %28 : vector<8x16xf32>
    %30 = arith.extui %29 : vector<8x16xi1> to vector<8x16xi32>
    %31 = arith.sitofp %30 : vector<8x16xi32> to vector<8x16xf32>
    %cst_7 = arith.constant dense<0.000000e+00> : vector<8xf32>
    %32 = vector.multi_reduction <add>, %31, %cst_7 [1] : vector<8x16xf32> to vector<8xf32>
    %33 = vector.shape_cast %32 : vector<8xf32> to vector<8x1xf32>
    %34 = arith.minimumf %33, %23 : vector<8x1xf32>
    %35 = arith.negf %27 : vector<8x1xf32>
    %36 = math.exp %35 : vector<8x1xf32>
    %cst_8 = arith.constant 1.000000e+00 : f32
    %37 = vector.broadcast %cst_8 : f32 to vector<8x1xf32>
    %38 = arith.addf %37, %36 : vector<8x1xf32>
    %39 = arith.divf %37, %38 : vector<8x1xf32>
    %40 = arith.mulf %39, %39 : vector<8x1xf32>
    %41 = arith.mulf %34, %40 : vector<8x1xf32>
    %42 = arith.mulf %41, %27 : vector<8x1xf32>
    %43 = arith.addf %20, %42 : vector<8x1xf32>
    %44 = arith.mulf %34, %40 : vector<8x1xf32>
    %45 = arith.addf %22, %44 : vector<8x1xf32>
    %46 = arith.divf %43, %45 : vector<8x1xf32>
    %cst_9 = arith.constant 0.000000e+00 : f32
    %47 = vector.broadcast %cst_9 : f32 to vector<8x1xf32>
    %cst_10 = arith.constant 2.000000e+00 : f32
    %48 = vector.broadcast %cst_10 : f32 to vector<8x1xf32>
    %cst_11 = arith.constant dense<0x7F800000> : vector<8xf32>
    %49 = vector.multi_reduction <minimumf>, %0, %cst_11 [1] : vector<8x16xf32> to vector<8xf32>
    %50 = vector.shape_cast %49 : vector<8xf32> to vector<8x1xf32>
    %51 = vector.broadcast %50 : vector<8x1xf32> to vector<8x16xf32>
    %52 = arith.cmpf oeq, %0, %51 : vector<8x16xf32>
    %53 = arith.extui %52 : vector<8x16xi1> to vector<8x16xi32>
    %54 = arith.sitofp %53 : vector<8x16xi32> to vector<8x16xf32>
    %cst_12 = arith.constant dense<0.000000e+00> : vector<8xf32>
    %55 = vector.multi_reduction <add>, %54, %cst_12 [1] : vector<8x16xf32> to vector<8xf32>
    %56 = vector.shape_cast %55 : vector<8xf32> to vector<8x1xf32>
    %57 = arith.minimumf %56, %48 : vector<8x1xf32>
    %58 = arith.negf %50 : vector<8x1xf32>
    %59 = math.exp %58 : vector<8x1xf32>
    %cst_13 = arith.constant 1.000000e+00 : f32
    %60 = vector.broadcast %cst_13 : f32 to vector<8x1xf32>
    %61 = arith.addf %60, %59 : vector<8x1xf32>
    %62 = arith.divf %60, %61 : vector<8x1xf32>
    %cst_14 = arith.constant 1.000000e+00 : f32
    %63 = vector.broadcast %cst_14 : f32 to vector<8x1xf32>
    %64 = arith.subf %63, %62 : vector<8x1xf32>
    %65 = arith.mulf %64, %64 : vector<8x1xf32>
    %66 = arith.mulf %57, %65 : vector<8x1xf32>
    %67 = arith.mulf %66, %50 : vector<8x1xf32>
    %68 = arith.addf %47, %67 : vector<8x1xf32>
    %69 = arith.mulf %57, %65 : vector<8x1xf32>
    %70 = arith.addf %47, %69 : vector<8x1xf32>
    %71 = arith.mulf %62, %62 : vector<8x1xf32>
    %72 = arith.mulf %57, %71 : vector<8x1xf32>
    %73 = arith.addf %47, %72 : vector<8x1xf32>
    %74 = arith.subf %48, %57 : vector<8x1xf32>
    %cst_15 = arith.constant 1.000000e+30 : f32
    %75 = vector.broadcast %cst_15 : f32 to vector<8x16xf32>
    %76 = arith.select %52, %75, %0 : vector<8x16xi1>, vector<8x16xf32>
    %cst_16 = arith.constant dense<0x7F800000> : vector<8xf32>
    %77 = vector.multi_reduction <minimumf>, %76, %cst_16 [1] : vector<8x16xf32> to vector<8xf32>
    %78 = vector.shape_cast %77 : vector<8xf32> to vector<8x1xf32>
    %79 = vector.broadcast %78 : vector<8x1xf32> to vector<8x16xf32>
    %80 = arith.cmpf oeq, %76, %79 : vector<8x16xf32>
    %81 = arith.extui %80 : vector<8x16xi1> to vector<8x16xi32>
    %82 = arith.sitofp %81 : vector<8x16xi32> to vector<8x16xf32>
    %cst_17 = arith.constant dense<0.000000e+00> : vector<8xf32>
    %83 = vector.multi_reduction <add>, %82, %cst_17 [1] : vector<8x16xf32> to vector<8xf32>
    %84 = vector.shape_cast %83 : vector<8xf32> to vector<8x1xf32>
    %85 = arith.minimumf %84, %74 : vector<8x1xf32>
    %86 = arith.negf %78 : vector<8x1xf32>
    %87 = math.exp %86 : vector<8x1xf32>
    %cst_18 = arith.constant 1.000000e+00 : f32
    %88 = vector.broadcast %cst_18 : f32 to vector<8x1xf32>
    %89 = arith.addf %88, %87 : vector<8x1xf32>
    %90 = arith.divf %88, %89 : vector<8x1xf32>
    %cst_19 = arith.constant 1.000000e+00 : f32
    %91 = vector.broadcast %cst_19 : f32 to vector<8x1xf32>
    %92 = arith.subf %91, %90 : vector<8x1xf32>
    %93 = arith.mulf %92, %92 : vector<8x1xf32>
    %94 = arith.mulf %85, %93 : vector<8x1xf32>
    %95 = arith.mulf %94, %78 : vector<8x1xf32>
    %96 = arith.addf %68, %95 : vector<8x1xf32>
    %97 = arith.mulf %85, %93 : vector<8x1xf32>
    %98 = arith.addf %70, %97 : vector<8x1xf32>
    %99 = arith.mulf %90, %90 : vector<8x1xf32>
    %100 = arith.mulf %85, %99 : vector<8x1xf32>
    %101 = arith.addf %73, %100 : vector<8x1xf32>
    %102 = arith.divf %96, %98 : vector<8x1xf32>
    %cst_20 = arith.constant 1.000000e+00 : f32
    %103 = vector.broadcast %cst_20 : f32 to vector<8x1xf32>
    %104 = arith.mulf %103, %102 : vector<8x1xf32>
    %105 = arith.addf %46, %104 : vector<8x1xf32>
    %cst_21 = arith.constant 2.000000e+00 : f32
    %106 = vector.broadcast %cst_21 : f32 to vector<8x1xf32>
    %107 = arith.divf %101, %106 : vector<8x1xf32>
    %c0_22 = arith.constant 0 : index
    %c0_23 = arith.constant 0 : index
    %108 = vector.load %arg2[%c0_22, %c0_23] : memref<8x1xf32, #tpu.memory_space<vmem>>, vector<8x1xf32>
    tpu.vector_store %arg2[%c0_22, %c0_23], %105 {strides = array<i32>} : memref<8x1xf32, #tpu.memory_space<vmem>>, vector<8x1xf32>,
    %c0_24 = arith.constant 0 : index
    %c0_25 = arith.constant 0 : index
    %109 = vector.load %arg3[%c0_24, %c0_25] : memref<8x1xf32, #tpu.memory_space<vmem>>, vector<8x1xf32>
    tpu.vector_store %arg3[%c0_24, %c0_25], %107 {strides = array<i32>} : memref<8x1xf32, #tpu.memory_space<vmem>>, vector<8x1xf32>,
    return
  }
  func.func @transform_0(%arg0: i32) -> (i32, i32) {
    %c0_i32 = arith.constant 0 : i32
    %c0_i32_0 = arith.constant 0 : i32
    return %arg0, %c0_i32 : i32, i32
  }
  func.func @transform_1(%arg0: i32) -> (i32, i32) {
    %c0_i32 = arith.constant 0 : i32
    %c0_i32_0 = arith.constant 0 : i32
    return %arg0, %c0_i32 : i32, i32
  }
  func.func @transform_2(%arg0: i32) -> (i32, i32) {
    %c0_i32 = arith.constant 0 : i32
    %c0_i32_0 = arith.constant 0 : i32
    return %arg0, %c0_i32 : i32, i32
  }
}

</mosaic_0001>

<bundles_post_ra>
// kernel: tpu_custom_call.1
= control target key start
LH: loop header
LB: loop body
LE: loop exit
PB: predicated region body
PF: predicated region fallthrough
CT: control target
= control target key end

     0   :  { %8 = vsyncpa [#allocation3], 0  ;;  %s284_s12 = smov [#allocation2]   ;;  %s374_s0 = inlined_call_operand.hbm [shape: f32[8,16], index: 0, kind: input, shape index: {}]   ;;  %s375_s1 = inlined_call_operand.vmem [shape: f32[8,1], index: 1, kind: output, shape index: {0}]   ;;  %s376_s2 = inlined_call_operand.vmem [shape: f32[8,1], index: 2, kind: output, shape index: {1}]  }
   0x1   :  { %s14_s11 = sshll.u32 %s374_s0, 4  ;;  %s16_s13 = sshll.u32 %s284_s12, 4  ;;  %s15_s11 = int_to_ptr.hbm [resolvable:$true] %s14_s11  ;;  %s17_s13 = int_to_ptr.vmem [resolvable:$true] %s16_s13 }
   0x2   :  { %19 = dma.hbm_to_vmem [thread:$0]  %s15_s11, 128, %s17_s13, [#allocation3]  }
   0x3   :  { %282 = dma.done.wait [#allocation3], 128  }
   0x4   :  { %283 = vsyncadd [#allocation3], 4294967168  ;;  %vm25_vm0 = vcmask 130048   ;;  %v24_v0 = vld [vmem:[#allocation2] sm:$0xff]  ;;  %v285_v5 = vmov 0.0   ;;  %v286_v47 = vmov 2.0  }
   0x5   :  { %v26_v1 = vsel %vm25_vm0, %v24_v0, -inf  ;;  %v111_v2 = vsel %vm25_vm0, %v24_v0, inf }
   0x6   :  { %27 = vmax.xlane.f32.xlu0 %v26_v1 }
   0xe   :  { %112 = vmin.xlane.f32.xlu0 %v111_v2 }
  0x79   :  { %v307_v3 = vpop.xlane.xlu0 %27 }
  0x7a   :  { %vm29_vm1 = vcmp.eq.f32.partialorder %v24_v0, %v307_v3  ;;  %v226_v20 = vmul.f32 -1.442695, %v307_v3 }
  0x7b   :  { %v61_v4 = vsel %vm29_vm1, -1e+30, %v24_v0  ;;  %v225_v6 = vsel %vm29_vm1, 1.0, %v285_v5 }
  0x7c   :  { %v62_v7 = vsel %vm25_vm0, %v61_v4, -inf  ;;  %v32_v8 = vsel %vm25_vm0, %v225_v6, 0.0  ;;  %236 = vpow2.f32 %v226_v20 }
  0x7d   :  { %63 = vmax.xlane.f32.xlu1 %v62_v7  ;;  %33 = vadd.xlane.f32.xlu2 %v32_v8 }
  0x81   :  { %v312_v9 = vpop.xlane.xlu0 %112 }
  0x82   :  { %vm114_vm2 = vcmp.eq.f32.partialorder %v24_v0, %v312_v9  ;;  %v230_v22 = vmul.f32 -1.442695, %v312_v9  ;;  %v237_v24 = vpop.eup %236 }
  0x83   :  { %v150_v10 = vsel %vm114_vm2, 1e+30, %v24_v0  ;;  %v229_v11 = vsel %vm114_vm2, 1.0, %v285_v5  ;;  %v39_v27 = vadd.f32 1.0, %v237_v24 }
  0x84   :  { %v151_v12 = vsel %vm25_vm0, %v150_v10, inf  ;;  %v117_v13 = vsel %vm25_vm0, %v229_v11, 0.0 }
  0x85   :  { %152 = vmin.xlane.f32.xlu1 %v151_v12  ;;  %118 = vadd.xlane.f32.xlu2 %v117_v13  ;;  %v49_v49 = vand.u32 2147483647, %v39_v27  ;;  %v51_v50 = vand.u32 2147483648, %v39_v27  ;;  %vm45_vm6 = vweird.f32 %v39_v27 }
  0x87   :  { %vm50_vm10 = vcmp.eq.f32.partialorder %v49_v49, 8.507059e+37  ;;  %v52_v60 = vor.u32 1.1754944e-38, %v51_v50 }
  0xf0   :  { %v317_v14 = vpop.xlane.xlu1 %63  ;;  %v34_v51 = vpop.xlane.xlu2 %33 }
  0xf1   :  { %vm65_vm3 = vcmp.eq.f32.partialorder %v61_v4, %v317_v14  ;;  %v228_v21 = vmul.f32 -1.442695, %v317_v14  ;;  %v35_v0 = vmin.f32 %v34_v51, 2.0 }
  0xf2   :  { %v227_v15 = vsel %vm65_vm3, 1.0, %v285_v5 }
  0xf3   :  { %v68_v16 = vsel %vm25_vm0, %v227_v15, 0.0  ;;  %238 = vpow2.f32 %v228_v21  ;;  %v60_v15 = vsub.f32 2.0, %v35_v0 }
  0xf4   :  { %69 = vadd.xlane.f32.xlu0 %v68_v16  ;;  %240 = vpow2.f32 %v230_v22 }
  0xf8   :  { %v321_v17 = vpop.xlane.xlu1 %152  ;;  %v119_v20 = vpop.xlane.xlu2 %118 }
  0xf9   :  { %vm154_vm4 = vcmp.eq.f32.partialorder %v150_v10, %v321_v17  ;;  %v232_v23 = vmul.f32 -1.442695, %v321_v17  ;;  %v239_v25 = vpop.eup %238 }
  0xfa   :  { %v231_v18 = vsel %vm154_vm4, 1.0, %v285_v5  ;;  %v241_v26 = vpop.eup %240  ;;  %v75_v28 = vadd.f32 1.0, %v239_v25 }
  0xfb   :  { %v157_v19 = vsel %vm25_vm0, %v231_v18, 0.0  ;;  %242 = vpow2.f32 %v232_v23  ;;  %v124_v30 = vadd.f32 1.0, %v241_v26 }
  0xfc   :  { %158 = vadd.xlane.f32.xlu1 %v157_v19  ;;  %244 = vrcp.f32 %v39_v27  ;;  %v87_v56 = vand.u32 2147483648, %v75_v28  ;;  %vm81_vm11 = vweird.f32 %v75_v28  ;;  %v85_v58 = vand.u32 2147483647, %v75_v28 }
  0xfd   :  { %246 = vrcp.f32 %v75_v28  ;;  %vm130_vm12 = vweird.f32 %v124_v30  ;;  %v134_v61 = vand.u32 2147483647, %v124_v30  ;;  %v136_v62 = vand.u32 2147483648, %v124_v30 }
  0xfe   :  { %248 = vrcp.f32 %v124_v30  ;;  %v88_v7 = vor.u32 1.1754944e-38, %v87_v56  ;;  %vm86_vm0 = vcmp.eq.f32.partialorder %v85_v58, 8.507059e+37 }
  0xff   :  { %v137_v12 = vor.u32 1.1754944e-38, %v136_v62  ;;  %vm135_vm3 = vcmp.eq.f32.partialorder %v134_v61, 8.507059e+37 }
 0x101   :  { %v243_v29 = vpop.eup %242 }
 0x102   :  { %v329_v31 = vadd.f32 1.0, %v243_v29  ;;  %v245_v32 = vpop.eup %244 }
 0x103   :  { %v247_v33 = vpop.eup %246  ;;  %v41_v35 = vmul.f32 %v245_v32, %v39_v27  ;;  %vm46_vm5 = vweird.f32 %v245_v32 }
 0x104   :  { %250 = vrcp.f32 %v329_v31  ;;  %v249_v34 = vpop.eup %248  ;;  %v77_v36 = vmul.f32 %v247_v33, %v75_v28  ;;  %vm82_vm7 = vweird.f32 %v247_v33  ;;  %vm337_vm8 = vmor %vm45_vm6, %vm46_vm5  ;;  %v176_v8 = vand.u32 2147483648, %v329_v31 }
 0x105   :  { %v126_v38 = vmul.f32 %v249_v34, %v124_v30  ;;  %v42_v39 = vsub.f32 1.0, %v41_v35  ;;  %252 = vrcp.f32 %v286_v47  ;;  %vm131_vm9 = vweird.f32 %v249_v34  ;;  %vm344_vm13 = vmor %vm81_vm11, %vm82_vm7 }
 0x106   :  { %v78_v40 = vsub.f32 1.0, %v77_v36  ;;  %vm348_vm14 = vmor %vm130_vm12, %vm131_vm9  ;;  %vm170_vm1 = vweird.f32 %v329_v31  ;;  %v174_v10 = vand.u32 2147483647, %v329_v31  ;;  %v177_v22 = vor.u32 1.1754944e-38, %v176_v8 }
 0x107   :  { %v127_v42 = vsub.f32 1.0, %v126_v38  ;;  %v43_v43 = vmul.f32 %v245_v32, %v42_v39  ;;  %v120_v28 = vmin.f32 %v119_v20, 2.0  ;;  %vm213_vm6 = vcmask 7168  }
 0x108   :  { %v79_v44 = vmul.f32 %v247_v33, %v78_v40  ;;  %vm175_vm4 = vcmp.eq.f32.partialorder %v174_v10, 8.507059e+37 }
 0x109   :  { %v128_v46 = vmul.f32 %v249_v34, %v127_v42  ;;  %v44_v48 = vadd.f32 %v245_v32, %v43_v43 }
 0x10a   :  { %v332_v37 = vpop.eup %250  ;;  %v80_v52 = vadd.f32 %v247_v33, %v79_v44 }
 0x10b   :  { %v166_v41 = vmul.f32 %v332_v37, %v329_v31  ;;  %v129_v55 = vadd.f32 %v249_v34, %v128_v46  ;;  %v48_v57 = vsel %vm337_vm8, %v245_v32, %v44_v48  ;;  %v253_v59 = vpop.eup %252  ;;  %vm171_vm15 = vweird.f32 %v332_v37 }
 0x10c   :  { %v84_v2 = vsel %vm344_vm13, %v247_v33, %v80_v52  ;;  %v53_v5 = vsel %vm50_vm10, %v52_v60, %v48_v57  ;;  %v206_v11 = vmul.f32 2.0, %v253_v59  ;;  %vm172_vm2 = vmor %vm170_vm1, %vm171_vm15  ;;  %vm210_vm5 = vweird.f32 %v253_v59 }
 0x10d   :  { %v167_v45 = vsub.f32 1.0, %v166_v41  ;;  %v133_v6 = vsel %vm348_vm14, %v249_v34, %v129_v55  ;;  %v89_v13 = vsel %vm86_vm0, %v88_v7, %v84_v2  ;;  %v55_v18 = vmul.f32 %v53_v5, %v53_v5 }
 0x10e   :  { %v138_v19 = vsel %vm135_vm3, %v137_v12, %v133_v6  ;;  %v91_v23 = vmul.f32 %v89_v13, %v89_v13  ;;  %v207_v25 = vsub.f32 1.0, %v206_v11  ;;  %v149_v34 = vsub.f32 2.0, %v120_v28 }
 0x10f   :  { %v168_v53 = vmul.f32 %v332_v37, %v167_v45  ;;  %v56_v27 = vmul.f32 %v55_v18, %v35_v0  ;;  %v140_v30 = vsub.f32 1.0, %v138_v19  ;;  %v146_v36 = vmul.f32 %v138_v19, %v138_v19 }
 0x110   :  { %v208_v33 = vmul.f32 %v253_v59, %v207_v25 }
 0x111   :  { %v169_v4 = vadd.f32 %v332_v37, %v168_v53  ;;  %v141_v35 = vmul.f32 %v140_v30, %v140_v30  ;;  %v147_v43 = vmul.f32 %v146_v36, %v120_v28  ;;  %v57_v2 = vmul.f32 %v56_v27, %v307_v3 }
 0x112   :  { %v209_v40 = vadd.f32 %v253_v59, %v208_v33 }
 0x113   :  { %v173_v16 = vsel %vm172_vm2, %v332_v37, %v169_v4  ;;  %v142_v42 = vmul.f32 %v141_v35, %v120_v28 }
 0x114   :  { %v178_v26 = vsel %vm175_vm4, %v177_v22, %v173_v16  ;;  %v211_v47 = vsel %vm210_vm5, %v253_v59, %v209_v40 }
 0x115   :  { %v180_v32 = vsub.f32 1.0, %v178_v26  ;;  %v186_v39 = vmul.f32 %v178_v26, %v178_v26  ;;  %v143_v5 = vmul.f32 %v142_v42, %v312_v9 }
 0x117   :  { %v181_v38 = vmul.f32 %v180_v32, %v180_v32 }
 0x167   :  { %v70_v21 = vpop.xlane.xlu0 %69 }
 0x168   :  { %v71_v24 = vmin.f32 %v70_v21, %v60_v15 }
 0x16a   :  { %v92_v29 = vmul.f32 %v91_v23, %v71_v24 }
 0x16c   :  { %v95_v31 = vadd.f32 %v92_v29, %v56_v27  ;;  %v93_v60 = vmul.f32 %v92_v29, %v317_v14 }
 0x16e   :  { %254 = vrcp.f32 %v95_v31  ;;  %v107_v57 = vand.u32 2147483648, %v95_v31  ;;  %vm101_vm8 = vweird.f32 %v95_v31  ;;  %v105_v58 = vand.u32 2147483647, %v95_v31 }
 0x16f   :  { %v159_v37 = vpop.xlane.xlu1 %158  ;;  %v94_v14 = vadd.f32 %v93_v60, %v57_v2 }
 0x170   :  { %v160_v41 = vmin.f32 %v159_v37, %v149_v34  ;;  %v108_v4 = vor.u32 1.1754944e-38, %v107_v57  ;;  %vm106_vm11 = vcmp.eq.f32.partialorder %v105_v58, 8.507059e+37 }
 0x172   :  { %v182_v44 = vmul.f32 %v181_v38, %v160_v41  ;;  %v187_v45 = vmul.f32 %v186_v39, %v160_v41 }
 0x174   :  { %v255_v46 = vpop.eup %254  ;;  %v185_v48 = vadd.f32 %v182_v44, %v142_v42  ;;  %v188_v49 = vadd.f32 %v187_v45, %v147_v43  ;;  %v183_v61 = vmul.f32 %v182_v44, %v321_v17 }
 0x175   :  { %v97_v50 = vmul.f32 %v255_v46, %v95_v31  ;;  %vm102_vm7 = vweird.f32 %v255_v46 }
 0x176   :  { %256 = vrcp.f32 %v185_v48  ;;  %v212_v52 = vmul.f32 %v211_v47, %v188_v49  ;;  %vm103_vm9 = vmor %vm101_vm8, %vm102_vm7  ;;  %v200_v62 = vand.u32 2147483648, %v185_v48  ;;  %v198_v1 = vand.u32 2147483647, %v185_v48 }
 0x177   :  { %v98_v51 = vsub.f32 1.0, %v97_v50  ;;  %vm194_vm12 = vweird.f32 %v185_v48  ;;  %v184_v10 = vadd.f32 %v183_v61, %v143_v5 }
 0x178   :  { %215 = vst.msk [vmem:[%s376_s2] sm:$0xff] %vm213_vm6, %v212_v52  ;;  %v201_v8 = vor.u32 1.1754944e-38, %v200_v62  ;;  %vm199_vm14 = vcmp.eq.f32.partialorder %v198_v1, 8.507059e+37 }
 0x179   :  { %v99_v53 = vmul.f32 %v255_v46, %v98_v51 }
 0x17b   :  { %v100_v55 = vadd.f32 %v255_v46, %v99_v53 }
 0x17c   :  { %v257_v54 = vpop.eup %256 }
 0x17d   :  { %v190_v56 = vmul.f32 %v257_v54, %v185_v48  ;;  %v104_v63 = vsel %vm103_vm9, %v255_v46, %v100_v55  ;;  %vm195_vm10 = vweird.f32 %v257_v54 }
 0x17e   :  { %v109_v7 = vsel %vm106_vm11, %v108_v4, %v104_v63  ;;  %vm196_vm13 = vmor %vm194_vm12, %vm195_vm10 }
 0x17f   :  { %v191_v59 = vsub.f32 1.0, %v190_v56  ;;  %v110_v12 = vmul.f32 %v109_v7, %v94_v14 }
 0x181   :  { %v192_v0 = vmul.f32 %v257_v54, %v191_v59 }
 0x183   :  { %v193_v6 = vadd.f32 %v257_v54, %v192_v0 }
 0x185   :  { %v197_v11 = vsel %vm196_vm13, %v257_v54, %v193_v6 }
 0x186   :  { %v202_v17 = vsel %vm199_vm14, %v201_v8, %v197_v11 }
 0x187   :  { %v203_v13 = vmul.f32 %v202_v17, %v184_v10 }
 0x189   :  { %v204_v15 = vadd.f32 %v203_v13, %v110_v12 }
 0x18b   :  { %214 = vst.msk [vmem:[%s375_s1] sm:$0xff] %vm213_vm6, %v204_v15 }
 0x18c   :  { %224 = vsyncpa [#allocation3], 1 }

</bundles_post_ra>
